<compile_context>
chip_gen: v6e
topology: v6e:2x2x1
jax: 0.10.0
libtpu: 0.0.40
codegen_flags: <defaults>
</compile_context>

<pallas_src>
import functools

import jax
import jax.numpy as jnp
from jax.experimental import pallas as pl
from jax.experimental.pallas import tpu as pltpu


# --------------------------------------------------------------------------- small utilities

def _bilinear_upsample_matrix(n_in: int) -> jnp.ndarray:
    """(2*n_in, n_in) matrix of PyTorch bilinear weights, scale=2, align_corners=False."""
    n_out = 2 * n_in
    src = (jnp.arange(n_out, dtype=jnp.float32) + 0.5) * 0.5 - 0.5
    src = jnp.maximum(src, 0.0)                      # PyTorch clamps negative source coords
    i0 = jnp.minimum(jnp.floor(src).astype(jnp.int32), n_in - 1)
    i1 = jnp.minimum(i0 + 1, n_in - 1)
    l1 = src - i0.astype(jnp.float32)
    l0 = 1.0 - l1
    rows = jnp.arange(n_out)
    u = jnp.zeros((n_out, n_in), jnp.float32)
    u = u.at[rows, i0].add(l0)
    u = u.at[rows, i1].add(l1)
    return u


def _vmem_capacity_bytes() -> int:
    try:
        return int(pltpu.get_tpu_info().vmem_capacity_bytes)
    except Exception:
        return 64 * 1024 * 1024                      # v7x per-TC VMEM (smallest current gen)


def _sub(x: int) -> int:                             # sublane padding
    return ((x + 7) // 8) * 8


def _lane(x: int) -> int:                            # lane padding
    return max(((x + 127) // 128) * 128, 128)


def _channel_block_candidates(cout: int):
    """Full cout first, then multiple-of-8 divisors (descending) -- all satisfy (8,128)."""
    cands = [cout]
    for dc in range(cout - 1, 7, -1):
        if cout % dc == 0 and dc % 8 == 0:
            cands.append(dc)
    return cands


def _kron_vmem_bytes(dc, cin, hw, itemsize):
    io = itemsize
    x_blk    = 2 * _sub(cin) * _lane(hw) * io            # double-buffered x block
    w_blk    = 2 * _sub(dc) * _lane(cin) * io             # conv-weight block
    u_blk    = 2 * _sub(hw) * _lane(4 * hw) * io          # resident kron matrix
    skip_blk = 2 * _sub(dc) * _lane(4 * hw) * io
    out_blk  = 2 * _sub(dc) * _lane(4 * hw) * io
    interm   = (_sub(dc) * _lane(hw) * (4 + io)           # z (f32) + cast copy
                + 2 * _sub(dc) * _lane(4 * hw) * 4)       # y (f32) + add temp
    return x_blk + w_blk + u_blk + skip_blk + out_blk + interm


def _separable_vmem_bytes(dc, cin, h, w, itemsize):
    io = itemsize
    h2, w2 = 2 * h, 2 * w
    x_blk    = 2 * _sub(cin) * _lane(h * w) * io
    w_blk    = 2 * _sub(dc) * _lane(cin) * io
    uwt_blk  = 2 * _sub(w) * _lane(w2) * io
    uh_blk   = 2 * _sub(h2) * _lane(h) * io
    skip_blk = 2 * dc * _sub(h2) * _lane(w2) * io
    out_blk  = 2 * dc * _sub(h2) * _lane(w2) * io
    interm   = (dc * _sub(h) * _lane(w) * (4 + io)        # z + cast
                + dc * _sub(h) * _lane(w2) * (4 + io)     # t + cast
                + dc * _sub(h2) * _lane(h) * io           # materialized U_H broadcast
                + 2 * dc * _sub(h2) * _lane(w2) * 4)      # y (f32) + add temp
    return x_blk + w_blk + uwt_blk + uh_blk + skip_blk + out_blk + interm


# --------------------------------------------------------------------------------- kernels

def _skip_upsample_kron_kernel(x_ref, w_ref, u_ref, skip_ref, o_ref):
    """One program = (batch i, output-channel group j).

    x_ref   : (1, Cin, H*W)   NCHW input, spatial flattened (free wrapper reshape)
    w_ref   : (dc, Cin)       1x1-conv weight block
    u_ref   : (H*W, 4*H*W)    kron(U_H^T, U_W^T): separable bilinear 2x upsample, resident
    skip_ref: (1, dc, 4*H*W)  lane-dense flat skip block
    o_ref   : (1, dc, 4*H*W)  lane-dense flat output block
    """
    # (1) 1x1 conv at LOW resolution (conv and upsample commute) -- MXU, f32 accumulate.
    z = jnp.dot(w_ref[...], x_ref[0], preferred_element_type=jnp.float32)      # (dc, HW)
    # (2) single resident upsample matmul; result is already in the flat row-major layout.
    #     For f32 inputs the cast is a no-op, so no intermediate rounding vs the reference.
    y = jnp.dot(z.astype(u_ref.dtype), u_ref[...],
                preferred_element_type=jnp.float32)                             # (dc, 4HW)
    # (3) residual add; emit in the input dtype (lane-dense, unmasked stores).
    o_ref[0] = (y + skip_ref[0].astype(jnp.float32)).astype(o_ref.dtype)


def _skip_upsample_separable_kernel(x_ref, w_ref, uwt_ref, uh_ref, skip_ref, o_ref, *, h, w):
    """Fallback for large H*W where kron(U_H^T, U_W^T) does not fit VMEM (2W >= 128 there)."""
    # TODO(synk): restructure this large-spatial path into pure 2-D matmuls (fold channels
    # into M) to remove the lane->sublane reshape and the materialized U_H broadcast.
    cdt = x_ref.dtype
    x = x_ref[0]                                                        # (Cin, H*W)
    z = jnp.dot(w_ref[...], x, preferred_element_type=jnp.float32)      # (dc, H*W)
    dc = z.shape[0]
    zs = z.astype(cdt).reshape(dc * h, w)
    t = jnp.dot(zs, uwt_ref[...], preferred_element_type=jnp.float32)   # (dc*H, 2W)
    t3 = t.astype(cdt).reshape(dc, h, 2 * w)
    uh_b = jnp.broadcast_to(uh_ref[...][None], (dc, 2 * h, h))
    y = jnp.einsum('dph,dhq->dpq', uh_b, t3,
                   preferred_element_type=jnp.float32)                  # (dc, 2H, 2W)
    o_ref[0] = (y + skip_ref[0].astype(jnp.float32)).astype(o_ref.dtype)


# --------------------------------------------------------------------------------- wrapper

@jax.jit
def skip_upsample(x_nchw, skip_nchw, conv_weight):
    """Pallas implementation of SkipUpsample.forward.

    x_nchw     : (N, Cin, H, W)         Cin = in_channels + scale_factor
    skip_nchw  : (N, Cout, 2H, 2W)      Cout = in_channels
    conv_weight: (Cout, Cin, 1, 1)      nn.Conv2d weight, bias=False
    returns    : (N, Cout, 2H, 2W)      in x's dtype
    """
    n, cin, h, w = x_nchw.shape
    cout = conv_weight.shape[0]
    h2, w2 = 2 * h, 2 * w
    hw = h * w
    dtype = x_nchw.dtype
    itemsize = jnp.dtype(dtype).itemsize

    cap = _vmem_capacity_bytes()
    budget = int(0.70 * cap)

    # ---- plan: kron path when U = (HW, 4HW) comfortably fits VMEM (and the extra MACs stay
    #      under the HBM roofline), otherwise the separable fallback.
    plan = None
    if hw <= 1024:
        for dc in _channel_block_candidates(cout):
            if _kron_vmem_bytes(dc, cin, hw, itemsize) <= budget:
                plan = ("kron", dc, _kron_vmem_bytes(dc, cin, hw, itemsize))
                break
    if plan is None:
        cands = _channel_block_candidates(cout)
        for dc in cands:
            if _separable_vmem_bytes(dc, cin, h, w, itemsize) <= budget:
                plan = ("separable", dc, _separable_vmem_bytes(dc, cin, h, w, itemsize))
                break
        if plan is None:                                     # last resort: smallest legal block
            dc = cands[-1]
            plan = ("separable", dc, _separable_vmem_bytes(dc, cin, h, w, itemsize))

    mode, dc, need = plan
    g = cout // dc
    vmem_limit = int(min(0.9 * cap, max(need * 1.25, 32 * 1024 * 1024)))

    compiler_params = pltpu.CompilerParams(
        dimension_semantics=("parallel", "parallel"),        # batch axis first (megacore split)
        vmem_limit_bytes=vmem_limit)

    # Tiny parameter setup (plain JAX glue).
    wmat = conv_weight.reshape(cout, cin).astype(dtype)      # (Cout, Cin)
    uh = _bilinear_upsample_matrix(h)                        # (2H, H)  f32
    uw = _bilinear_upsample_matrix(w)                        # (2W, W)  f32

    if mode == "kron":
        # Separable bilinear collapsed into one resident matrix (exact in bf16: weights are
        # multiples of 1/16):  y_flat = z @ kron(U_H^T, U_W^T).
        u = jnp.kron(uh.T, uw.T).astype(dtype)               # (HW, 4HW)
        x_flat = x_nchw.reshape(n, cin, hw)                  # free contiguous reshape
        skip_flat = skip_nchw.reshape(n, cout, 4 * hw)       # free contiguous reshape

        flops = 2 * n * cout * cin * hw + 2 * n * cout * hw * 4 * hw + n * cout * 4 * hw
        bytes_accessed = itemsize * (n * cin * hw + 2 * n * cout * 4 * hw
                                     + cout * cin + hw * 4 * hw)

        out_flat = pl.pallas_call(
            _skip_upsample_kron_kernel,
            out_shape=jax.ShapeDtypeStruct((n, cout, 4 * hw), dtype),
            grid=(n, g),
            in_specs=[
                pl.BlockSpec((1, cin, hw), lambda i, j: (i, 0, 0)),      # x (reused across j)
                pl.BlockSpec((dc, cin), lambda i, j: (j, 0)),            # conv weight block
                pl.BlockSpec((hw, 4 * hw), lambda i, j: (0, 0)),         # U (resident)
                pl.BlockSpec((1, dc, 4 * hw), lambda i, j: (i, j, 0)),   # skip (lane-dense)
            ],
            out_specs=pl.BlockSpec((1, dc, 4 * hw), lambda i, j: (i, j, 0)),
            compiler_params=compiler_params,
            cost_estimate=pl.CostEstimate(flops=int(flops), transcendentals=0,
                                          bytes_accessed=int(bytes_accessed)),
        )(x_flat, wmat, u, skip_flat)
        return out_flat.reshape(n, cout, h2, w2)             # free contiguous reshape

    # ---- separable fallback (large H*W): 2W >= 128 there, so 4-D blocks are lane-dense.
    uwt = uw.T.astype(dtype)                                 # (W, 2W)
    uhc = uh.astype(dtype)                                   # (2H, H)
    x_flat = x_nchw.reshape(n, cin, hw)

    flops = (2 * n * cout * cin * hw + 2 * n * cout * hw * w2
             + 2 * n * cout * h2 * h * w2 + n * cout * h2 * w2)
    bytes_accessed = itemsize * (n * cin * hw + 2 * n * cout * h2 * w2
                                 + cout * cin + w * w2 + h2 * h)

    kernel = functools.partial(_skip_upsample_separable_kernel, h=h, w=w)
    return pl.pallas_call(
        kernel,
        out_shape=jax.ShapeDtypeStruct((n, cout, h2, w2), dtype),
        grid=(n, g),
        in_specs=[
            pl.BlockSpec((1, cin, hw), lambda i, j: (i, 0, 0)),          # x
            pl.BlockSpec((dc, cin), lambda i, j: (j, 0)),                # conv weight block
            pl.BlockSpec((w, w2), lambda i, j: (0, 0)),                  # U_W^T (resident)
            pl.BlockSpec((h2, h), lambda i, j: (0, 0)),                  # U_H   (resident)
            pl.BlockSpec((1, dc, h2, w2), lambda i, j: (i, j, 0, 0)),    # skip block
        ],
        out_specs=pl.BlockSpec((1, dc, h2, w2), lambda i, j: (i, j, 0, 0)),
        compiler_params=compiler_params,
        cost_estimate=pl.CostEstimate(flops=int(flops), transcendentals=0,
                                      bytes_accessed=int(bytes_accessed)),
    )(x_flat, wmat, uwt, uhc, skip_nchw)


# -------------------------------------------------------------------------------- reference

def _reference(x, skip, conv_weight):
    """Pure-JAX reference of the PyTorch forward (bilinear 2x, align_corners=False)."""
    _, _, hh, ww = x.shape

    def interp(arr, axis, n_in):
        n_out = 2 * n_in
        src = jnp.maximum((jnp.arange(n_out, dtype=jnp.float32) + 0.5) * 0.5 - 0.5, 0.0)
        i0 = jnp.minimum(jnp.floor(src).astype(jnp.int32), n_in - 1)
        i1 = jnp.minimum(i0 + 1, n_in - 1)
        l1 = src - i0.astype(jnp.float32)
        shape = [1] * arr.ndim
        shape[axis] = n_out
        l1 = l1.reshape(shape)
        a0 = jnp.take(arr, i0, axis=axis)
        a1 = jnp.take(arr, i1, axis=axis)
        return a0 * (1.0 - l1) + a1 * l1

    up = interp(interp(x, 3, ww), 2, hh)
    y = jnp.einsum('nchw,dc->ndhw', up, conv_weight.reshape(conv_weight.shape[0], -1))
    return y + skip


if __name__ == "__main__":
    key = jax.random.PRNGKey(0)
    k_x, k_skip, k_w = jax.random.split(key, 3)

    batch, in_channels, scale_factor = 2, 8, 0
    H = W = 16
    cin = in_channels + scale_factor
    cout = in_channels

    x = jax.random.normal(k_x, (batch, cin, H, W), dtype=jnp.float32)
    skip = jax.random.normal(k_skip, (batch, cout, 2 * H, 2 * W), dtype=jnp.float32)
    # Deterministic Conv2d(cin -> cout, k=1, bias=False) weight.
    conv_weight = (jax.random.normal(k_w, (cout, cin, 1, 1), dtype=jnp.float32)
                   * (1.0 / jnp.sqrt(cin)))

    out = skip_upsample(x, skip, conv_weight)
    out = jax.block_until_ready(out)

    ref = _reference(x, skip, conv_weight)
    assert out.shape == (batch, cout, 2 * H, 2 * W), out.shape
    assert out.dtype == x.dtype, out.dtype
    assert jnp.allclose(out, ref, atol=1e-4, rtol=1e-4), float(jnp.max(jnp.abs(out - ref)))

    print("KERNEL_OK")
</pallas_src>

<mosaic_0001>
module attributes {stable_mosaic.version = 11 : i64} {
  func.func private @main(%arg0: i32) attributes {dimension_semantics = [#tpu.dimension_semantics<core_parallel>], iteration_bounds = array<i64: 2>, tpu.core_type = #tpu.core_type<sc_scalar_subcore>, window_params = []} {
    return
  }
}

module attributes {stable_mosaic.version = 11 : i64} {
  func.func private @main(%arg0: i32) attributes {dimension_semantics = [#tpu.dimension_semantics<core_parallel>], iteration_bounds = array<i64: 2>, tpu.core_type = #tpu.core_type<sc_scalar_subcore>, window_params = []} {
    return
  }
}

module attributes {stable_mosaic.version = 11 : i64} {
  func.func @_skip_upsample_kron_kernel(%arg0: i32, %arg1: i32, %arg2: memref<1x8x256xf32, #tpu.memory_space<vmem>>, %arg3: memref<8x8xf32, #tpu.memory_space<vmem>>, %arg4: memref<256x1024xf32, #tpu.memory_space<vmem>>, %arg5: memref<1x8x1024xf32, #tpu.memory_space<vmem>>, %arg6: memref<1x8x1024xf32, #tpu.memory_space<vmem>>) attributes {dimension_semantics = [#tpu.dimension_semantics<parallel>, #tpu.dimension_semantics<parallel>], iteration_bounds = array<i64: 2, 1>, scalar_prefetch = 0 : i64, scratch_operands = 0 : i64, tpu.core_type = #tpu.core_type<tc>, window_params = [{transform_indices = @transform_0, window_bounds = array<i64: 1, 8, 256>}, {transform_indices = @transform_1, window_bounds = array<i64: 8, 8>}, {pipeline_mode = #tpu.pipeline_mode<synchronous>, transform_indices = @transform_2, window_bounds = array<i64: 256, 1024>}, {transform_indices = @transform_3, window_bounds = array<i64: 1, 8, 1024>}, {transform_indices = @transform_4, window_bounds = array<i64: 1, 8, 1024>}]} {
    %c0 = arith.constant 0 : index
    %c0_0 = arith.constant 0 : index
    %0 = vector.load %arg3[%c0, %c0_0] : memref<8x8xf32, #tpu.memory_space<vmem>>, vector<8x8xf32>
    %c0_1 = arith.constant 0 : index
    %c0_2 = arith.constant 0 : index
    %c0_3 = arith.constant 0 : index
    %1 = vector.load %arg2[%c0_1, %c0_2, %c0_3] : memref<1x8x256xf32, #tpu.memory_space<vmem>>, vector<1x8x256xf32>
    %2 = vector.shape_cast %1 : vector<1x8x256xf32> to vector<8x256xf32>
    %cst = arith.constant dense<0.000000e+00> : vector<8x256xf32>
    %3 = tpu.matmul %0, %2, %cst {dimension_numbers = #tpu.dot_dimension_numbers<[1], [0], [0], [1], [0, 0, 1, 1], [], []>} : vector<8x8xf32>, vector<8x256xf32>, vector<8x256xf32> -> vector<8x256xf32>
    %c0_4 = arith.constant 0 : index
    %c0_5 = arith.constant 0 : index
    %4 = vector.load %arg4[%c0_4, %c0_5] : memref<256x1024xf32, #tpu.memory_space<vmem>>, vector<256x1024xf32>
    %cst_6 = arith.constant dense<0.000000e+00> : vector<8x1024xf32>
    %5 = tpu.matmul %3, %4, %cst_6 {dimension_numbers = #tpu.dot_dimension_numbers<[1], [0], [0], [1], [0, 0, 1, 1], [], []>} : vector<8x256xf32>, vector<256x1024xf32>, vector<8x1024xf32> -> vector<8x1024xf32>
    %c0_7 = arith.constant 0 : index
    %c0_8 = arith.constant 0 : index
    %c0_9 = arith.constant 0 : index
    %6 = vector.load %arg5[%c0_7, %c0_8, %c0_9] : memref<1x8x1024xf32, #tpu.memory_space<vmem>>, vector<1x8x1024xf32>
    %7 = vector.shape_cast %6 : vector<1x8x1024xf32> to vector<8x1024xf32>
    %8 = arith.addf %5, %7 : vector<8x1024xf32>
    %c0_10 = arith.constant 0 : index
    %c0_11 = arith.constant 0 : index
    %c0_12 = arith.constant 0 : index
    %9 = vector.load %arg6[%c0_10, %c0_11, %c0_12] : memref<1x8x1024xf32, #tpu.memory_space<vmem>>, vector<1x8x1024xf32>
    %10 = vector.shape_cast %9 : vector<1x8x1024xf32> to vector<8x1024xf32>
    %11 = vector.shape_cast %8 : vector<8x1024xf32> to vector<1x8x1024xf32>
    tpu.vector_store %arg6[%c0_10, %c0_11, %c0_12], %11 {strides = array<i32>} : memref<1x8x1024xf32, #tpu.memory_space<vmem>>, vector<1x8x1024xf32>,
    return
  }
  func.func @transform_0(%arg0: i32, %arg1: i32) -> (i32, i32, i32) {
    %c0_i32 = arith.constant 0 : i32
    %c0_i32_0 = arith.constant 0 : i32
    %c0_i32_1 = arith.constant 0 : i32
    return %arg0, %c0_i32, %c0_i32_0 : i32, i32, i32
  }
  func.func @transform_1(%arg0: i32, %arg1: i32) -> (i32, i32) {
    %c0_i32 = arith.constant 0 : i32
    %c0_i32_0 = arith.constant 0 : i32
    return %arg1, %c0_i32 : i32, i32
  }
  func.func @transform_2(%arg0: i32, %arg1: i32) -> (i32, i32) {
    %c0_i32 = arith.constant 0 : i32
    %c0_i32_0 = arith.constant 0 : i32
    %c0_i32_1 = arith.constant 0 : i32
    return %c0_i32, %c0_i32_0 : i32, i32
  }
  func.func @transform_3(%arg0: i32, %arg1: i32) -> (i32, i32, i32) {
    %c0_i32 = arith.constant 0 : i32
    %c0_i32_0 = arith.constant 0 : i32
    return %arg0, %arg1, %c0_i32 : i32, i32, i32
  }
  func.func @transform_4(%arg0: i32, %arg1: i32) -> (i32, i32, i32) {
    %c0_i32 = arith.constant 0 : i32
    %c0_i32_0 = arith.constant 0 : i32
    return %arg0, %arg1, %c0_i32 : i32, i32, i32
  }
}

</mosaic_0001>

<bundles_post_ra>
// kernel: skip_upsample.1
= control target key start
LH: loop header
LB: loop body
LE: loop exit
PB: predicated region body
PF: predicated region fallthrough
CT: control target
= control target key end

     0   :  { %s1118_s15 = smov 0   ;;  %s1120_s16 = smov 0   ;;  %s1935_s0 = inlined_call_operand.vmem [shape: f32[2,8,256], index: 0, kind: input, shape index: {}]   ;;  %s1936_s1 = inlined_call_operand.vmem [shape: f32[8,8], index: 1, kind: input, shape index: {}]   ;;  %s1937_s2 = inlined_call_operand.vmem [shape: f32[256,1024], index: 2, kind: input, shape index: {}]   ;;  %s1938_s3 = inlined_call_operand.vmem [shape: f32[2,8,1024], index: 3, kind: input, shape index: {}]   ;;  %s1939_s4 = inlined_call_operand.vmem [shape: f32[2,8,1024], index: 4, kind: output, shape index: {}]  }
   0x1   :  { %s1122_s17 = smov 0  }
   0x2 LB: > { %s26_s18 = sadd.s32 1, %s1086_s16  ;;  %p1030_p0 = scmp.ge.s32.totalorder %s1090_s17, 1  ;;  %s1090_s17 = sphi %s1122_s17, %s14_s17   ;;  %s1086_s16 = sphi %s1120_s16, %s1941_s16   ;;  %s1082_s15 = sphi %s1118_s15, %s1940_s15  }
   0x3   : > { %p28_p1 = scmp.ge.s32.totalorder %s26_s18, 2  ;;  %p201_p2 = scmp.lt.s32.totalorder %s1090_s17, 3 }
   0x5   : > { %s1943_s18 = smov (%p28_p1, %s26_s18), 0  ;;  %p202_p3 = pnand %p1030_p0, %p201_p2 }
   0x6   : > { %p244_p4 = scmp.lt.s32.totalorder (!%p202_p3), %s1082_s15, 1 }
   0x7   : > { %205 = sbr.rel (%p202_p3) target bundleno = 478 (0x1de), region = 36 }
   0xc   : > { %v470_v0 = vld [vmem:[%s1937_s2 + $0x3c8] sm:$0xff]  ;;  %v1092_v1 = vmov 0.0   ;;  %v469_v2 = vld [vmem:[%s1937_s2 + $0x3c0] sm:$0xff]  ;;  %s1945_s15 = smov (!%p244_p4, %s1082_s15), 1  ;;  %vm274_vm0 = vcmask 64512   ;;  %v472_v12 = vld [vmem:[%s1937_s2 + $0x3d8] sm:$0xff] }
   0xd   : > { %342 = vmatprep.mubr.f32.mxu0 %v1092_v1  ;;  %613 = vmatprep.subr.mxu1 %v470_v0  ;;  %v462_v3 = vld [vmem:[%s1937_s2 + $0x388] sm:$0xff]  ;;  %v461_v4 = vld [vmem:[%s1937_s2 + $0x380] sm:$0xff]  ;;  %s1040_s5 = sshll.u32 %s1945_s15, 4  ;;  %v471_v13 = vld [vmem:[%s1937_s2 + $0x3d0] sm:$0xff] }
   0xe   : > { %614 = vmatpush1.msra.mxu1 %v469_v2  ;;  %v454_v5 = vld [vmem:[%s1937_s2 + $0x348] sm:$0xff]  ;;  %v453_v6 = vld [vmem:[%s1937_s2 + $0x340] sm:$0xff]  ;;  %s248_s10 = scalar_lea.vmem %s1935_s0, %s1040_s5  ;;  %v464_v15 = vld [vmem:[%s1937_s2 + $0x398] sm:$0xff]  ;;  %s1041_s5 = sshll.u32 %s1945_s15, 6 }
   0xf   : > { %615 = vmatprep.subr.mxu1 %v462_v3  ;;  %v446_v7 = vld [vmem:[%s1937_s2 + $0x308] sm:$0xff]  ;;  %v271_v8 = vld [vmem:[%s1936_s1] sm:$0xff]  ;;  %v463_v17 = vld [vmem:[%s1937_s2 + $0x390] sm:$0xff]  ;;  %s261_s8 = scalar_lea.vmem %s1938_s3, %s1041_s5  ;;  %s270_s11 = scalar_lea.vmem %s1939_s4, %s1041_s5 }
  0x10   : > { %616 = vmatpush1.msra.mxu1 %v461_v4  ;;  %v445_v9 = vld [vmem:[%s1937_s2 + $0x300] sm:$0xff]  ;;  %v273_v10 = vld [vmem:[%s248_s10 + $0x8] sm:$0xff]  ;;  %v456_v19 = vld [vmem:[%s1937_s2 + $0x358] sm:$0xff] }
  0x11   : > { %617 = vmatprep.subr.mxu1 %v454_v5  ;;  %v272_v11 = vld [vmem:[%s248_s10] sm:$0xff]  ;;  %308 = vmatprep.subr.mxu0 %v273_v10  ;;  %v438_v14 = vld [vmem:[%s1937_s2 + $0x2c8] sm:$0xff]  ;;  %v455_v21 = vld [vmem:[%s1937_s2 + $0x350] sm:$0xff] }
  0x12   : > { %618 = vmatpush1.msra.mxu1 %v453_v6  ;;  %309 = vmatpush1.msra.mxu0 %v272_v11  ;;  %v437_v16 = vld [vmem:[%s1937_s2 + $0x2c0] sm:$0xff]  ;;  %v430_v18 = vld [vmem:[%s1937_s2 + $0x288] sm:$0xff]  ;;  %v448_v23 = vld [vmem:[%s1937_s2 + $0x318] sm:$0xff] }
  0x13   : > { %619 = vmatprep.subr.mxu1 %v446_v7  ;;  %1037 = vmatmul.mubr.msk.f32.vlgmr.msra.gmra.mxu0 %vm274_vm0, %v271_v8  ;;  %v429_v20 = vld [vmem:[%s1937_s2 + $0x280] sm:$0xff]  ;;  %v422_v22 = vld [vmem:[%s1937_s2 + $0x248] sm:$0xff]  ;;  %v447_v25 = vld [vmem:[%s1937_s2 + $0x310] sm:$0xff] }
  0x14   : > { %620 = vmatpush1.msra.mxu1 %v445_v9  ;;  %684 = vmatprep.subr.mxu0 %v472_v12  ;;  %v421_v24 = vld [vmem:[%s1937_s2 + $0x240] sm:$0xff]  ;;  %v414_v26 = vld [vmem:[%s1937_s2 + $0x208] sm:$0xff]  ;;  %v440_v27 = vld [vmem:[%s1937_s2 + $0x2d8] sm:$0xff] }
  0x15   : > { %685 = vmatpush1.msra.mxu0 %v471_v13  ;;  %621 = vmatprep.subr.mxu1 %v438_v14  ;;  %v413_v28 = vld [vmem:[%s1937_s2 + $0x200] sm:$0xff]  ;;  %v439_v29 = vld [vmem:[%s1937_s2 + $0x2d0] sm:$0xff]  ;;  %v406_v30 = vld [vmem:[%s1937_s2 + $0x1c8] sm:$0xff] }
  0x16   : > { %686 = vmatprep.subr.mxu0 %v464_v15  ;;  %622 = vmatpush1.msra.mxu1 %v437_v16  ;;  %v432_v31 = vld [vmem:[%s1937_s2 + $0x298] sm:$0xff]  ;;  %v405_v32 = vld [vmem:[%s1937_s2 + $0x1c0] sm:$0xff]  ;;  %v431_v33 = vld [vmem:[%s1937_s2 + $0x290] sm:$0xff] }
  0x17   : > { %687 = vmatpush1.msra.mxu0 %v463_v17  ;;  %623 = vmatprep.subr.mxu1 %v430_v18  ;;  %v398_v34 = vld [vmem:[%s1937_s2 + $0x188] sm:$0xff]  ;;  %v424_v35 = vld [vmem:[%s1937_s2 + $0x258] sm:$0xff]  ;;  %v397_v36 = vld [vmem:[%s1937_s2 + $0x180] sm:$0xff] }
  0x18   : > { %688 = vmatprep.subr.mxu0 %v456_v19  ;;  %624 = vmatpush1.msra.mxu1 %v429_v20  ;;  %v423_v37 = vld [vmem:[%s1937_s2 + $0x250] sm:$0xff]  ;;  %v390_v38 = vld [vmem:[%s1937_s2 + $0x148] sm:$0xff]  ;;  %v416_v39 = vld [vmem:[%s1937_s2 + $0x218] sm:$0xff] }
  0x19   : > { %689 = vmatpush1.msra.mxu0 %v455_v21  ;;  %625 = vmatprep.subr.mxu1 %v422_v22  ;;  %v389_v40 = vld [vmem:[%s1937_s2 + $0x140] sm:$0xff]  ;;  %v415_v41 = vld [vmem:[%s1937_s2 + $0x210] sm:$0xff]  ;;  %v382_v42 = vld [vmem:[%s1937_s2 + $0x108] sm:$0xff] }
  0x1a   : > { %690 = vmatprep.subr.mxu0 %v448_v23  ;;  %626 = vmatpush1.msra.mxu1 %v421_v24  ;;  %v408_v43 = vld [vmem:[%s1937_s2 + $0x1d8] sm:$0xff]  ;;  %v381_v44 = vld [vmem:[%s1937_s2 + $0x100] sm:$0xff]  ;;  %v407_v45 = vld [vmem:[%s1937_s2 + $0x1d0] sm:$0xff] }
  0x1b   : > { %691 = vmatpush1.msra.mxu0 %v447_v25  ;;  %627 = vmatprep.subr.mxu1 %v414_v26  ;;  %v374_v46 = vld [vmem:[%s1937_s2 + $0xc8] sm:$0xff]  ;;  %v400_v47 = vld [vmem:[%s1937_s2 + $0x198] sm:$0xff]  ;;  %v373_v48 = vld [vmem:[%s1937_s2 + $0xc0] sm:$0xff] }
  0x1c   : > { %692 = vmatprep.subr.mxu0 %v440_v27  ;;  %628 = vmatpush1.msra.mxu1 %v413_v28  ;;  %v399_v49 = vld [vmem:[%s1937_s2 + $0x190] sm:$0xff]  ;;  %v366_v50 = vld [vmem:[%s1937_s2 + $0x88] sm:$0xff]  ;;  %v392_v51 = vld [vmem:[%s1937_s2 + $0x158] sm:$0xff] }
  0x1d   : > { %693 = vmatpush1.msra.mxu0 %v439_v29  ;;  %629 = vmatprep.subr.mxu1 %v406_v30  ;;  %v365_v52 = vld [vmem:[%s1937_s2 + $0x80] sm:$0xff]  ;;  %v391_v53 = vld [vmem:[%s1937_s2 + $0x150] sm:$0xff]  ;;  %v358_v54 = vld [vmem:[%s1937_s2 + $0x48] sm:$0xff] }
  0x1e   : > { %694 = vmatprep.subr.mxu0 %v432_v31  ;;  %630 = vmatpush1.msra.mxu1 %v405_v32  ;;  %v384_v55 = vld [vmem:[%s1937_s2 + $0x118] sm:$0xff]  ;;  %v357_v56 = vld [vmem:[%s1937_s2 + $0x40] sm:$0xff]  ;;  %v383_v57 = vld [vmem:[%s1937_s2 + $0x110] sm:$0xff] }
  0x1f   : > { %695 = vmatpush1.msra.mxu0 %v431_v33  ;;  %631 = vmatprep.subr.mxu1 %v398_v34  ;;  %v350_v58 = vld [vmem:[%s1937_s2 + $0x8] sm:$0xff]  ;;  %v376_v59 = vld [vmem:[%s1937_s2 + $0xd8] sm:$0xff]  ;;  %v349_v60 = vld [vmem:[%s1937_s2] sm:$0xff] }
  0x20   : > { %696 = vmatprep.subr.mxu0 %v424_v35  ;;  %632 = vmatpush1.msra.mxu1 %v397_v36  ;;  %v375_v61 = vld [vmem:[%s1937_s2 + $0xd0] sm:$0xff]  ;;  %v598_v62 = vld [vmem:[%s1937_s2 + $0x7c8] sm:$0xff]  ;;  %v368_v63 = vld [vmem:[%s1937_s2 + $0x98] sm:$0xff] }
  0x21   : > { %697 = vmatpush1.msra.mxu0 %v423_v37  ;;  %633 = vmatprep.subr.mxu1 %v390_v38  ;;  %v597_v0 = vld [vmem:[%s1937_s2 + $0x7c0] sm:$0xff]  ;;  %v367_v1 = vld [vmem:[%s1937_s2 + $0x90] sm:$0xff]  ;;  %v590_v2 = vld [vmem:[%s1937_s2 + $0x788] sm:$0xff] }
  0x22   : > { %698 = vmatprep.subr.mxu0 %v416_v39  ;;  %634 = vmatpush1.msra.mxu1 %v389_v40  ;;  %v360_v3 = vld [vmem:[%s1937_s2 + $0x58] sm:$0xff]  ;;  %v589_v4 = vld [vmem:[%s1937_s2 + $0x780] sm:$0xff]  ;;  %v359_v5 = vld [vmem:[%s1937_s2 + $0x50] sm:$0xff] }
  0x23   : > { %699 = vmatpush1.msra.mxu0 %v415_v41  ;;  %635 = vmatprep.subr.mxu1 %v382_v42  ;;  %v582_v6 = vld [vmem:[%s1937_s2 + $0x748] sm:$0xff]  ;;  %v352_v7 = vld [vmem:[%s1937_s2 + $0x18] sm:$0xff]  ;;  %v581_v8 = vld [vmem:[%s1937_s2 + $0x740] sm:$0xff] }
  0x24   : > { %700 = vmatprep.subr.mxu0 %v408_v43  ;;  %636 = vmatpush1.msra.mxu1 %v381_v44  ;;  %v351_v9 = vld [vmem:[%s1937_s2 + $0x10] sm:$0xff]  ;;  %v574_v10 = vld [vmem:[%s1937_s2 + $0x708] sm:$0xff]  ;;  %v600_v11 = vld [vmem:[%s1937_s2 + $0x7d8] sm:$0xff] }
  0x25   : > { %701 = vmatpush1.msra.mxu0 %v407_v45  ;;  %637 = vmatprep.subr.mxu1 %v374_v46  ;;  %v573_v12 = vld [vmem:[%s1937_s2 + $0x700] sm:$0xff]  ;;  %v599_v13 = vld [vmem:[%s1937_s2 + $0x7d0] sm:$0xff]  ;;  %v566_v14 = vld [vmem:[%s1937_s2 + $0x6c8] sm:$0xff] }
  0x26   : > { %702 = vmatprep.subr.mxu0 %v400_v47  ;;  %638 = vmatpush1.msra.mxu1 %v373_v48  ;;  %v592_v15 = vld [vmem:[%s1937_s2 + $0x798] sm:$0xff]  ;;  %v565_v16 = vld [vmem:[%s1937_s2 + $0x6c0] sm:$0xff]  ;;  %v591_v17 = vld [vmem:[%s1937_s2 + $0x790] sm:$0xff] }
  0x27   : > { %703 = vmatpush1.msra.mxu0 %v399_v49  ;;  %639 = vmatprep.subr.mxu1 %v366_v50  ;;  %v558_v18 = vld [vmem:[%s1937_s2 + $0x688] sm:$0xff]  ;;  %v584_v19 = vld [vmem:[%s1937_s2 + $0x758] sm:$0xff]  ;;  %v557_v20 = vld [vmem:[%s1937_s2 + $0x680] sm:$0xff] }
  0x28   : > { %704 = vmatprep.subr.mxu0 %v392_v51  ;;  %640 = vmatpush1.msra.mxu1 %v365_v52  ;;  %v583_v21 = vld [vmem:[%s1937_s2 + $0x750] sm:$0xff]  ;;  %v550_v22 = vld [vmem:[%s1937_s2 + $0x648] sm:$0xff]  ;;  %v576_v23 = vld [vmem:[%s1937_s2 + $0x718] sm:$0xff] }
  0x29   : > { %705 = vmatpush1.msra.mxu0 %v391_v53  ;;  %641 = vmatprep.subr.mxu1 %v358_v54  ;;  %v549_v24 = vld [vmem:[%s1937_s2 + $0x640] sm:$0xff]  ;;  %v575_v25 = vld [vmem:[%s1937_s2 + $0x710] sm:$0xff]  ;;  %v542_v26 = vld [vmem:[%s1937_s2 + $0x608] sm:$0xff] }
  0x2a   : > { %706 = vmatprep.subr.mxu0 %v384_v55  ;;  %642 = vmatpush1.msra.mxu1 %v357_v56  ;;  %v568_v27 = vld [vmem:[%s1937_s2 + $0x6d8] sm:$0xff]  ;;  %v541_v28 = vld [vmem:[%s1937_s2 + $0x600] sm:$0xff]  ;;  %v567_v29 = vld [vmem:[%s1937_s2 + $0x6d0] sm:$0xff] }
  0x2b   : > { %707 = vmatpush1.msra.mxu0 %v383_v57  ;;  %643 = vmatprep.subr.mxu1 %v350_v58  ;;  %v534_v30 = vld [vmem:[%s1937_s2 + $0x5c8] sm:$0xff]  ;;  %v560_v31 = vld [vmem:[%s1937_s2 + $0x698] sm:$0xff]  ;;  %v533_v32 = vld [vmem:[%s1937_s2 + $0x5c0] sm:$0xff] }
  0x2c   : > { %708 = vmatprep.subr.mxu0 %v376_v59  ;;  %644 = vmatpush1.msra.mxu1 %v349_v60  ;;  %v559_v33 = vld [vmem:[%s1937_s2 + $0x690] sm:$0xff]  ;;  %v526_v34 = vld [vmem:[%s1937_s2 + $0x588] sm:$0xff]  ;;  %v552_v35 = vld [vmem:[%s1937_s2 + $0x658] sm:$0xff] }
  0x2d   : > { %709 = vmatpush1.msra.mxu0 %v375_v61  ;;  %645 = vmatprep.subr.mxu1 %v598_v62  ;;  %v525_v36 = vld [vmem:[%s1937_s2 + $0x580] sm:$0xff]  ;;  %v551_v37 = vld [vmem:[%s1937_s2 + $0x650] sm:$0xff]  ;;  %v518_v38 = vld [vmem:[%s1937_s2 + $0x548] sm:$0xff] }
  0x2e   : > { %710 = vmatprep.subr.mxu0 %v368_v63  ;;  %646 = vmatpush2.msra.mxu1 %v597_v0  ;;  %v544_v39 = vld [vmem:[%s1937_s2 + $0x618] sm:$0xff]  ;;  %v517_v40 = vld [vmem:[%s1937_s2 + $0x540] sm:$0xff]  ;;  %v543_v41 = vld [vmem:[%s1937_s2 + $0x610] sm:$0xff] }
  0x2f   : > { %711 = vmatpush1.msra.mxu0 %v367_v1  ;;  %647 = vmatprep.subr.mxu1 %v590_v2  ;;  %v510_v42 = vld [vmem:[%s1937_s2 + $0x508] sm:$0xff]  ;;  %v536_v43 = vld [vmem:[%s1937_s2 + $0x5d8] sm:$0xff]  ;;  %v509_v44 = vld [vmem:[%s1937_s2 + $0x500] sm:$0xff] }
  0x30   : > { %712 = vmatprep.subr.mxu0 %v360_v3  ;;  %648 = vmatpush2.msra.mxu1 %v589_v4  ;;  %v535_v45 = vld [vmem:[%s1937_s2 + $0x5d0] sm:$0xff]  ;;  %v502_v46 = vld [vmem:[%s1937_s2 + $0x4c8] sm:$0xff]  ;;  %v528_v47 = vld [vmem:[%s1937_s2 + $0x598] sm:$0xff] }
  0x31   : > { %713 = vmatpush1.msra.mxu0 %v359_v5  ;;  %649 = vmatprep.subr.mxu1 %v582_v6  ;;  %v501_v48 = vld [vmem:[%s1937_s2 + $0x4c0] sm:$0xff]  ;;  %v527_v49 = vld [vmem:[%s1937_s2 + $0x590] sm:$0xff]  ;;  %v494_v50 = vld [vmem:[%s1937_s2 + $0x488] sm:$0xff] }
  0x32   : > { %714 = vmatprep.subr.mxu0 %v352_v7  ;;  %650 = vmatpush2.msra.mxu1 %v581_v8  ;;  %v520_v51 = vld [vmem:[%s1937_s2 + $0x558] sm:$0xff]  ;;  %v493_v52 = vld [vmem:[%s1937_s2 + $0x480] sm:$0xff]  ;;  %v519_v53 = vld [vmem:[%s1937_s2 + $0x550] sm:$0xff] }
  0x33   : > { %715 = vmatpush1.msra.mxu0 %v351_v9  ;;  %651 = vmatprep.subr.mxu1 %v574_v10  ;;  %v486_v54 = vld [vmem:[%s1937_s2 + $0x448] sm:$0xff]  ;;  %v512_v55 = vld [vmem:[%s1937_s2 + $0x518] sm:$0xff]  ;;  %v511_v56 = vld [vmem:[%s1937_s2 + $0x510] sm:$0xff] }
  0x34   : > { %716 = vmatprep.subr.mxu0 %v600_v11  ;;  %652 = vmatpush2.msra.mxu1 %v573_v12  ;;  %v504_v57 = vld [vmem:[%s1937_s2 + $0x4d8] sm:$0xff]  ;;  %v503_v58 = vld [vmem:[%s1937_s2 + $0x4d0] sm:$0xff]  ;;  %v485_v62 = vld [vmem:[%s1937_s2 + $0x440] sm:$0xff] }
  0x35   : > { %717 = vmatpush2.msra.mxu0 %v599_v13  ;;  %653 = vmatprep.subr.mxu1 %v566_v14  ;;  %v496_v59 = vld [vmem:[%s1937_s2 + $0x498] sm:$0xff]  ;;  %v495_v60 = vld [vmem:[%s1937_s2 + $0x490] sm:$0xff]  ;;  %v478_v0 = vld [vmem:[%s1937_s2 + $0x408] sm:$0xff] }
  0x36   : > { %718 = vmatprep.subr.mxu0 %v592_v15  ;;  %654 = vmatpush2.msra.mxu1 %v565_v16  ;;  %v488_v61 = vld [vmem:[%s1937_s2 + $0x458] sm:$0xff]  ;;  %v487_v63 = vld [vmem:[%s1937_s2 + $0x450] sm:$0xff]  ;;  %v477_v2 = vld [vmem:[%s1937_s2 + $0x400] sm:$0xff] }
  0x37   : > { %719 = vmatpush2.msra.mxu0 %v591_v17  ;;  %655 = vmatprep.subr.mxu1 %v558_v18  ;;  %v480_v1 = vld [vmem:[%s1937_s2 + $0x418] sm:$0xff]  ;;  %v479_v3 = vld [vmem:[%s1937_s2 + $0x410] sm:$0xff]  ;;  %v474_v4 = vld [vmem:[%s1937_s2 + $0x3e8] sm:$0xff] }
  0x38   : > { %720 = vmatprep.subr.mxu0 %v584_v19  ;;  %656 = vmatpush2.msra.mxu1 %v557_v20  ;;  %v476_v5 = vld [vmem:[%s1937_s2 + $0x3f8] sm:$0xff]  ;;  %v473_v8 = vld [vmem:[%s1937_s2 + $0x3e0] sm:$0xff]  ;;  %v475_v9 = vld [vmem:[%s1937_s2 + $0x3f0] sm:$0xff] }
  0x39   : > { %721 = vmatpush2.msra.mxu0 %v583_v21  ;;  %657 = vmatprep.subr.mxu1 %v550_v22  ;;  %v466_v10 = vld [vmem:[%s1937_s2 + $0x3a8] sm:$0xff]  ;;  %v468_v11 = vld [vmem:[%s1937_s2 + $0x3b8] sm:$0xff]  ;;  %v465_v12 = vld [vmem:[%s1937_s2 + $0x3a0] sm:$0xff] }
  0x3a   : > { %722 = vmatprep.subr.mxu0 %v576_v23  ;;  %658 = vmatpush2.msra.mxu1 %v549_v24  ;;  %v467_v13 = vld [vmem:[%s1937_s2 + $0x3b0] sm:$0xff]  ;;  %v458_v14 = vld [vmem:[%s1937_s2 + $0x368] sm:$0xff]  ;;  %v460_v15 = vld [vmem:[%s1937_s2 + $0x378] sm:$0xff] }
  0x3b   : > { %723 = vmatpush2.msra.mxu0 %v575_v25  ;;  %659 = vmatprep.subr.mxu1 %v542_v26  ;;  %v457_v16 = vld [vmem:[%s1937_s2 + $0x360] sm:$0xff]  ;;  %v459_v17 = vld [vmem:[%s1937_s2 + $0x370] sm:$0xff]  ;;  %v450_v18 = vld [vmem:[%s1937_s2 + $0x328] sm:$0xff] }
  0x3c   : > { %724 = vmatprep.subr.mxu0 %v568_v27  ;;  %660 = vmatpush2.msra.mxu1 %v541_v28  ;;  %v452_v19 = vld [vmem:[%s1937_s2 + $0x338] sm:$0xff]  ;;  %v449_v20 = vld [vmem:[%s1937_s2 + $0x320] sm:$0xff]  ;;  %v451_v21 = vld [vmem:[%s1937_s2 + $0x330] sm:$0xff] }
  0x3d   : > { %725 = vmatpush2.msra.mxu0 %v567_v29  ;;  %661 = vmatprep.subr.mxu1 %v534_v30  ;;  %v442_v22 = vld [vmem:[%s1937_s2 + $0x2e8] sm:$0xff]  ;;  %v444_v23 = vld [vmem:[%s1937_s2 + $0x2f8] sm:$0xff]  ;;  %v441_v24 = vld [vmem:[%s1937_s2 + $0x2e0] sm:$0xff] }
  0x3e   : > { %726 = vmatprep.subr.mxu0 %v560_v31  ;;  %662 = vmatpush2.msra.mxu1 %v533_v32  ;;  %v443_v25 = vld [vmem:[%s1937_s2 + $0x2f0] sm:$0xff]  ;;  %v434_v26 = vld [vmem:[%s1937_s2 + $0x2a8] sm:$0xff]  ;;  %v436_v27 = vld [vmem:[%s1937_s2 + $0x2b8] sm:$0xff] }
  0x3f   : > { %727 = vmatpush2.msra.mxu0 %v559_v33  ;;  %663 = vmatprep.subr.mxu1 %v526_v34  ;;  %v433_v28 = vld [vmem:[%s1937_s2 + $0x2a0] sm:$0xff]  ;;  %v435_v29 = vld [vmem:[%s1937_s2 + $0x2b0] sm:$0xff]  ;;  %v426_v30 = vld [vmem:[%s1937_s2 + $0x268] sm:$0xff] }
  0x40   : > { %728 = vmatprep.subr.mxu0 %v552_v35  ;;  %664 = vmatpush2.msra.mxu1 %v525_v36  ;;  %v428_v31 = vld [vmem:[%s1937_s2 + $0x278] sm:$0xff]  ;;  %v425_v32 = vld [vmem:[%s1937_s2 + $0x260] sm:$0xff]  ;;  %v427_v33 = vld [vmem:[%s1937_s2 + $0x270] sm:$0xff] }
  0x41   : > { %729 = vmatpush2.msra.mxu0 %v551_v37  ;;  %665 = vmatprep.subr.mxu1 %v518_v38  ;;  %v418_v34 = vld [vmem:[%s1937_s2 + $0x228] sm:$0xff]  ;;  %v420_v35 = vld [vmem:[%s1937_s2 + $0x238] sm:$0xff]  ;;  %v417_v36 = vld [vmem:[%s1937_s2 + $0x220] sm:$0xff] }
  0x42   : > { %730 = vmatprep.subr.mxu0 %v544_v39  ;;  %666 = vmatpush2.msra.mxu1 %v517_v40  ;;  %v419_v37 = vld [vmem:[%s1937_s2 + $0x230] sm:$0xff]  ;;  %v410_v38 = vld [vmem:[%s1937_s2 + $0x1e8] sm:$0xff]  ;;  %v412_v39 = vld [vmem:[%s1937_s2 + $0x1f8] sm:$0xff] }
  0x43   : > { %731 = vmatpush2.msra.mxu0 %v543_v41  ;;  %667 = vmatprep.subr.mxu1 %v510_v42  ;;  %v409_v40 = vld [vmem:[%s1937_s2 + $0x1e0] sm:$0xff]  ;;  %v411_v41 = vld [vmem:[%s1937_s2 + $0x1f0] sm:$0xff]  ;;  %v402_v42 = vld [vmem:[%s1937_s2 + $0x1a8] sm:$0xff] }
  0x44   : > { %732 = vmatprep.subr.mxu0 %v536_v43  ;;  %668 = vmatpush2.msra.mxu1 %v509_v44  ;;  %v404_v43 = vld [vmem:[%s1937_s2 + $0x1b8] sm:$0xff]  ;;  %v401_v44 = vld [vmem:[%s1937_s2 + $0x1a0] sm:$0xff] }
  0x45   : > { %733 = vmatpush2.msra.mxu0 %v535_v45  ;;  %669 = vmatprep.subr.mxu1 %v502_v46  ;;  %v403_v45 = vld [vmem:[%s1937_s2 + $0x1b0] sm:$0xff]  ;;  %v394_v46 = vld [vmem:[%s1937_s2 + $0x168] sm:$0xff] }
  0x46   : > { %734 = vmatprep.subr.mxu0 %v528_v47  ;;  %670 = vmatpush2.msra.mxu1 %v501_v48  ;;  %v396_v47 = vld [vmem:[%s1937_s2 + $0x178] sm:$0xff]  ;;  %v393_v48 = vld [vmem:[%s1937_s2 + $0x160] sm:$0xff] }
  0x47   : > { %735 = vmatpush2.msra.mxu0 %v527_v49  ;;  %671 = vmatprep.subr.mxu1 %v494_v50  ;;  %v395_v49 = vld [vmem:[%s1937_s2 + $0x170] sm:$0xff]  ;;  %v386_v50 = vld [vmem:[%s1937_s2 + $0x128] sm:$0xff] }
  0x48   : > { %736 = vmatprep.subr.mxu0 %v520_v51  ;;  %672 = vmatpush2.msra.mxu1 %v493_v52  ;;  %v388_v51 = vld [vmem:[%s1937_s2 + $0x138] sm:$0xff]  ;;  %v385_v52 = vld [vmem:[%s1937_s2 + $0x120] sm:$0xff] }
  0x49   : > { %737 = vmatpush2.msra.mxu0 %v519_v53  ;;  %673 = vmatprep.subr.mxu1 %v486_v54  ;;  %v387_v53 = vld [vmem:[%s1937_s2 + $0x130] sm:$0xff]  ;;  %v378_v54 = vld [vmem:[%s1937_s2 + $0xe8] sm:$0xff] }
  0x4a   : > { %738 = vmatprep.subr.mxu0 %v512_v55  ;;  %674 = vmatpush2.msra.mxu1 %v485_v62  ;;  %v380_v55 = vld [vmem:[%s1937_s2 + $0xf8] sm:$0xff]  ;;  %v362_v62 = vld [vmem:[%s1937_s2 + $0x68] sm:$0xff] }
  0x4b   : > { %739 = vmatpush2.msra.mxu0 %v511_v56  ;;  %675 = vmatprep.subr.mxu1 %v478_v0  ;;  %v377_v56 = vld [vmem:[%s1937_s2 + $0xe0] sm:$0xff] }
  0x4c   : > { %740 = vmatprep.subr.mxu0 %v504_v57  ;;  %676 = vmatpush2.msra.mxu1 %v477_v2  ;;  %v379_v57 = vld [vmem:[%s1937_s2 + $0xf0] sm:$0xff]  ;;  %v361_v0 = vld [vmem:[%s1937_s2 + $0x60] sm:$0xff]  ;;  %v354_v2 = vld [vmem:[%s1937_s2 + $0x28] sm:$0xff] }
  0x4d   : > { %741 = vmatpush2.msra.mxu0 %v503_v58  ;;  %755 = vmatprep.subr.mxu1 %v474_v4  ;;  %v370_v58 = vld [vmem:[%s1937_s2 + $0xa8] sm:$0xff]  ;;  %v353_v4 = vld [vmem:[%s1937_s2 + $0x20] sm:$0xff] }
  0x4e   : > { %742 = vmatprep.subr.mxu0 %v496_v59  ;;  %v372_v59 = vld [vmem:[%s1937_s2 + $0xb8] sm:$0xff] }
  0x4f   : > { %743 = vmatpush2.msra.mxu0 %v495_v60  ;;  %v369_v60 = vld [vmem:[%s1937_s2 + $0xa0] sm:$0xff] }
  0x50   : > { %744 = vmatprep.subr.mxu0 %v488_v61  ;;  %v371_v61 = vld [vmem:[%s1937_s2 + $0xb0] sm:$0xff] }
  0x51   : > { %745 = vmatpush2.msra.mxu0 %v487_v63  ;;  %v364_v63 = vld [vmem:[%s1937_s2 + $0x78] sm:$0xff] }
  0x52   : > { %746 = vmatprep.subr.mxu0 %v480_v1  ;;  %v363_v1 = vld [vmem:[%s1937_s2 + $0x70] sm:$0xff] }
  0x53   : > { %747 = vmatpush2.msra.mxu0 %v479_v3  ;;  %v356_v3 = vld [vmem:[%s1937_s2 + $0x38] sm:$0xff] }
  0x54   : > { %826 = vmatprep.subr.mxu0 %v476_v5  ;;  %v355_v5 = vld [vmem:[%s1937_s2 + $0x30] sm:$0xff] }
  0xd3   : > { %v1535_v6 = vpop.f32.mrf.mxu0 }
  0xd5   : > { %v346_v7 = vpop.f32.mrf.mxu0 }
  0xd6   : > { %677 = vmatprep.mubr.f32.mxu1 %v346_v7  ;;  %748 = vmatprep.mubr.f32.mxu0 %v346_v7 }
  0xd7   : > { %678 = vmatmul.mubr.f32.vlgmr.msra.gmra.mxu1 %v1535_v6  ;;  %749 = vmatmul.mubr.f32.vlgmr.msra.gmra.mxu0 %v1535_v6 }
  0xd8   : > { %756 = vmatpush1.msra.mxu1 %v473_v8  ;;  %827 = vmatpush1.msra.mxu0 %v475_v9  ;;  %v604_v8 = vld [vmem:[%s1937_s2 + $0x7f8] sm:$0xff]  ;;  %v601_v9 = vld [vmem:[%s1937_s2 + $0x7e0] sm:$0xff] }
  0xd9   : > { %757 = vmatprep.subr.mxu1 %v466_v10  ;;  %819 = vmatprep.mubr.f32.mxu1 %v346_v7  ;;  %v603_v10 = vld [vmem:[%s1937_s2 + $0x7f0] sm:$0xff] }
  0xda   : > { %828 = vmatprep.subr.mxu0 %v468_v11  ;;  %890 = vmatprep.mubr.f32.mxu0 %v346_v7  ;;  %v602_v7 = vld [vmem:[%s1937_s2 + $0x7e8] sm:$0xff] }
  0xdb   : > { %758 = vmatpush1.msra.mxu1 %v465_v12  ;;  %829 = vmatpush1.msra.mxu0 %v467_v13  ;;  %v594_v11 = vld [vmem:[%s1937_s2 + $0x7a8] sm:$0xff]  ;;  %v596_v12 = vld [vmem:[%s1937_s2 + $0x7b8] sm:$0xff]  ;;  %v593_v13 = vld [vmem:[%s1937_s2 + $0x7a0] sm:$0xff] }
  0xdc   : > { %759 = vmatprep.subr.mxu1 %v458_v14  ;;  %830 = vmatprep.subr.mxu0 %v460_v15  ;;  %v595_v14 = vld [vmem:[%s1937_s2 + $0x7b0] sm:$0xff]  ;;  %v586_v15 = vld [vmem:[%s1937_s2 + $0x768] sm:$0xff] }
  0xdd   : > { %760 = vmatpush1.msra.mxu1 %v457_v16  ;;  %831 = vmatpush1.msra.mxu0 %v459_v17  ;;  %v588_v16 = vld [vmem:[%s1937_s2 + $0x778] sm:$0xff]  ;;  %v585_v17 = vld [vmem:[%s1937_s2 + $0x760] sm:$0xff] }
  0xde   : > { %761 = vmatprep.subr.mxu1 %v450_v18  ;;  %832 = vmatprep.subr.mxu0 %v452_v19  ;;  %v587_v18 = vld [vmem:[%s1937_s2 + $0x770] sm:$0xff]  ;;  %v578_v19 = vld [vmem:[%s1937_s2 + $0x728] sm:$0xff] }
  0xdf   : > { %762 = vmatpush1.msra.mxu1 %v449_v20  ;;  %833 = vmatpush1.msra.mxu0 %v451_v21  ;;  %v580_v20 = vld [vmem:[%s1937_s2 + $0x738] sm:$0xff]  ;;  %v577_v21 = vld [vmem:[%s1937_s2 + $0x720] sm:$0xff] }
  0xe0   : > { %763 = vmatprep.subr.mxu1 %v442_v22  ;;  %834 = vmatprep.subr.mxu0 %v444_v23  ;;  %v579_v22 = vld [vmem:[%s1937_s2 + $0x730] sm:$0xff]  ;;  %v570_v23 = vld [vmem:[%s1937_s2 + $0x6e8] sm:$0xff] }
  0xe1   : > { %764 = vmatpush1.msra.mxu1 %v441_v24  ;;  %835 = vmatpush1.msra.mxu0 %v443_v25  ;;  %v572_v24 = vld [vmem:[%s1937_s2 + $0x6f8] sm:$0xff]  ;;  %v569_v25 = vld [vmem:[%s1937_s2 + $0x6e0] sm:$0xff] }
  0xe2   : > { %765 = vmatprep.subr.mxu1 %v434_v26  ;;  %836 = vmatprep.subr.mxu0 %v436_v27  ;;  %v571_v26 = vld [vmem:[%s1937_s2 + $0x6f0] sm:$0xff]  ;;  %v562_v27 = vld [vmem:[%s1937_s2 + $0x6a8] sm:$0xff] }
  0xe3   : > { %766 = vmatpush1.msra.mxu1 %v433_v28  ;;  %837 = vmatpush1.msra.mxu0 %v435_v29  ;;  %v564_v28 = vld [vmem:[%s1937_s2 + $0x6b8] sm:$0xff]  ;;  %v561_v29 = vld [vmem:[%s1937_s2 + $0x6a0] sm:$0xff] }
  0xe4   : > { %767 = vmatprep.subr.mxu1 %v426_v30  ;;  %838 = vmatprep.subr.mxu0 %v428_v31  ;;  %v563_v30 = vld [vmem:[%s1937_s2 + $0x6b0] sm:$0xff]  ;;  %v554_v31 = vld [vmem:[%s1937_s2 + $0x668] sm:$0xff] }
  0xe5   : > { %768 = vmatpush1.msra.mxu1 %v425_v32  ;;  %839 = vmatpush1.msra.mxu0 %v427_v33  ;;  %v556_v32 = vld [vmem:[%s1937_s2 + $0x678] sm:$0xff]  ;;  %v553_v33 = vld [vmem:[%s1937_s2 + $0x660] sm:$0xff] }
  0xe6   : > { %769 = vmatprep.subr.mxu1 %v418_v34  ;;  %840 = vmatprep.subr.mxu0 %v420_v35  ;;  %v555_v34 = vld [vmem:[%s1937_s2 + $0x670] sm:$0xff]  ;;  %v546_v35 = vld [vmem:[%s1937_s2 + $0x628] sm:$0xff] }
  0xe7   : > { %770 = vmatpush1.msra.mxu1 %v417_v36  ;;  %841 = vmatpush1.msra.mxu0 %v419_v37  ;;  %v548_v36 = vld [vmem:[%s1937_s2 + $0x638] sm:$0xff]  ;;  %v545_v37 = vld [vmem:[%s1937_s2 + $0x620] sm:$0xff] }
  0xe8   : > { %771 = vmatprep.subr.mxu1 %v410_v38  ;;  %842 = vmatprep.subr.mxu0 %v412_v39  ;;  %v547_v38 = vld [vmem:[%s1937_s2 + $0x630] sm:$0xff]  ;;  %v538_v39 = vld [vmem:[%s1937_s2 + $0x5e8] sm:$0xff] }
  0xe9   : > { %772 = vmatpush1.msra.mxu1 %v409_v40  ;;  %843 = vmatpush1.msra.mxu0 %v411_v41  ;;  %v540_v40 = vld [vmem:[%s1937_s2 + $0x5f8] sm:$0xff]  ;;  %v537_v41 = vld [vmem:[%s1937_s2 + $0x5e0] sm:$0xff] }
  0xea   : > { %773 = vmatprep.subr.mxu1 %v402_v42  ;;  %844 = vmatprep.subr.mxu0 %v404_v43  ;;  %v539_v42 = vld [vmem:[%s1937_s2 + $0x5f0] sm:$0xff]  ;;  %v530_v43 = vld [vmem:[%s1937_s2 + $0x5a8] sm:$0xff] }
  0xeb   : > { %774 = vmatpush1.msra.mxu1 %v401_v44  ;;  %845 = vmatpush1.msra.mxu0 %v403_v45  ;;  %v532_v44 = vld [vmem:[%s1937_s2 + $0x5b8] sm:$0xff]  ;;  %v529_v45 = vld [vmem:[%s1937_s2 + $0x5a0] sm:$0xff] }
  0xec   : > { %775 = vmatprep.subr.mxu1 %v394_v46  ;;  %846 = vmatprep.subr.mxu0 %v396_v47  ;;  %v531_v46 = vld [vmem:[%s1937_s2 + $0x5b0] sm:$0xff]  ;;  %v522_v47 = vld [vmem:[%s1937_s2 + $0x568] sm:$0xff] }
  0xed   : > { %776 = vmatpush1.msra.mxu1 %v393_v48  ;;  %847 = vmatpush1.msra.mxu0 %v395_v49  ;;  %v524_v48 = vld [vmem:[%s1937_s2 + $0x578] sm:$0xff]  ;;  %v521_v49 = vld [vmem:[%s1937_s2 + $0x560] sm:$0xff] }
  0xee   : > { %777 = vmatprep.subr.mxu1 %v386_v50  ;;  %848 = vmatprep.subr.mxu0 %v388_v51  ;;  %v523_v50 = vld [vmem:[%s1937_s2 + $0x570] sm:$0xff]  ;;  %v514_v51 = vld [vmem:[%s1937_s2 + $0x528] sm:$0xff] }
  0xef   : > { %778 = vmatpush1.msra.mxu1 %v385_v52  ;;  %849 = vmatpush1.msra.mxu0 %v387_v53  ;;  %v516_v52 = vld [vmem:[%s1937_s2 + $0x538] sm:$0xff]  ;;  %v513_v53 = vld [vmem:[%s1937_s2 + $0x520] sm:$0xff] }
  0xf0   : > { %779 = vmatprep.subr.mxu1 %v378_v54  ;;  %850 = vmatprep.subr.mxu0 %v380_v55  ;;  %v515_v54 = vld [vmem:[%s1937_s2 + $0x530] sm:$0xff]  ;;  %v506_v55 = vld [vmem:[%s1937_s2 + $0x4e8] sm:$0xff] }
  0xf1   : > { %780 = vmatpush1.msra.mxu1 %v377_v56  ;;  %851 = vmatpush1.msra.mxu0 %v379_v57  ;;  %v508_v56 = vld [vmem:[%s1937_s2 + $0x4f8] sm:$0xff]  ;;  %v505_v57 = vld [vmem:[%s1937_s2 + $0x4e0] sm:$0xff] }
  0xf2   : > { %781 = vmatprep.subr.mxu1 %v370_v58  ;;  %852 = vmatprep.subr.mxu0 %v372_v59  ;;  %v507_v58 = vld [vmem:[%s1937_s2 + $0x4f0] sm:$0xff]  ;;  %v498_v59 = vld [vmem:[%s1937_s2 + $0x4a8] sm:$0xff] }
  0xf3   : > { %782 = vmatpush1.msra.mxu1 %v369_v60  ;;  %853 = vmatpush1.msra.mxu0 %v371_v61  ;;  %v500_v60 = vld [vmem:[%s1937_s2 + $0x4b8] sm:$0xff]  ;;  %v497_v61 = vld [vmem:[%s1937_s2 + $0x4a0] sm:$0xff] }
  0xf4   : > { %783 = vmatprep.subr.mxu1 %v362_v62  ;;  %854 = vmatprep.subr.mxu0 %v364_v63  ;;  %v499_v62 = vld [vmem:[%s1937_s2 + $0x4b0] sm:$0xff]  ;;  %v490_v63 = vld [vmem:[%s1937_s2 + $0x468] sm:$0xff] }
  0xf5   : > { %784 = vmatpush1.msra.mxu1 %v361_v0  ;;  %855 = vmatpush1.msra.mxu0 %v363_v1  ;;  %v492_v0 = vld [vmem:[%s1937_s2 + $0x478] sm:$0xff]  ;;  %v489_v1 = vld [vmem:[%s1937_s2 + $0x460] sm:$0xff] }
  0xf6   : > { %785 = vmatprep.subr.mxu1 %v354_v2  ;;  %856 = vmatprep.subr.mxu0 %v356_v3  ;;  %v491_v2 = vld [vmem:[%s1937_s2 + $0x470] sm:$0xff]  ;;  %v482_v3 = vld [vmem:[%s1937_s2 + $0x428] sm:$0xff] }
  0xf7   : > { %786 = vmatpush1.msra.mxu1 %v353_v4  ;;  %857 = vmatpush1.msra.mxu0 %v355_v5  ;;  %v484_v4 = vld [vmem:[%s1937_s2 + $0x438] sm:$0xff]  ;;  %v481_v5 = vld [vmem:[%s1937_s2 + $0x420] sm:$0xff] }
  0xf8   : > { %787 = vmatprep.subr.mxu1 %v602_v7  ;;  %858 = vmatprep.subr.mxu0 %v604_v8  ;;  %v483_v7 = vld [vmem:[%s1937_s2 + $0x430] sm:$0xff]  ;;  %v605_v8 = vld [vmem:[%s261_s8] sm:$0xff] }
  0xf9   : > { %788 = vmatpush2.msra.mxu1 %v601_v9  ;;  %859 = vmatpush2.msra.mxu0 %v603_v10  ;;  %v607_v9 = vld [vmem:[%s261_s8 + $0x10] sm:$0xff] }
  0xfa   : > { %789 = vmatprep.subr.mxu1 %v594_v11  ;;  %860 = vmatprep.subr.mxu0 %v596_v12  ;;  %v606_v12 = vld [vmem:[%s261_s8 + $0x8] sm:$0xff] }
  0xfb   : > { %790 = vmatpush2.msra.mxu1 %v593_v13  ;;  %861 = vmatpush2.msra.mxu0 %v595_v14  ;;  %v608_v13 = vld [vmem:[%s261_s8 + $0x18] sm:$0xff] }
  0xfc   : > { %791 = vmatprep.subr.mxu1 %v586_v15  ;;  %862 = vmatprep.subr.mxu0 %v588_v16 }
  0xfd   : > { %792 = vmatpush2.msra.mxu1 %v585_v17  ;;  %863 = vmatpush2.msra.mxu0 %v587_v18 }
  0xfe   : > { %793 = vmatprep.subr.mxu1 %v578_v19  ;;  %864 = vmatprep.subr.mxu0 %v580_v20  ;;  %v609_v19 = vld [vmem:[%s261_s8 + $0x20] sm:$0xff]  ;;  %v611_v20 = vld [vmem:[%s261_s8 + $0x30] sm:$0xff] }
  0xff   : > { %794 = vmatpush2.msra.mxu1 %v577_v21  ;;  %865 = vmatpush2.msra.mxu0 %v579_v22 }
 0x100   : > { %795 = vmatprep.subr.mxu1 %v570_v23  ;;  %866 = vmatprep.subr.mxu0 %v572_v24  ;;  %v610_v23 = vld [vmem:[%s261_s8 + $0x28] sm:$0xff]  ;;  %v612_v24 = vld [vmem:[%s261_s8 + $0x38] sm:$0xff] }
 0x101   : > { %796 = vmatpush2.msra.mxu1 %v569_v25  ;;  %867 = vmatpush2.msra.mxu0 %v571_v26 }
 0x102   : > { %797 = vmatprep.subr.mxu1 %v562_v27  ;;  %868 = vmatprep.subr.mxu0 %v564_v28 }
 0x103   : > { %798 = vmatpush2.msra.mxu1 %v561_v29  ;;  %869 = vmatpush2.msra.mxu0 %v563_v30 }
 0x104   : > { %799 = vmatprep.subr.mxu1 %v554_v31  ;;  %870 = vmatprep.subr.mxu0 %v556_v32 }
 0x105   : > { %800 = vmatpush2.msra.mxu1 %v553_v33  ;;  %871 = vmatpush2.msra.mxu0 %v555_v34 }
 0x106   : > { %801 = vmatprep.subr.mxu1 %v546_v35  ;;  %872 = vmatprep.subr.mxu0 %v548_v36 }
 0x107   : > { %802 = vmatpush2.msra.mxu1 %v545_v37  ;;  %873 = vmatpush2.msra.mxu0 %v547_v38 }
 0x108   : > { %803 = vmatprep.subr.mxu1 %v538_v39  ;;  %874 = vmatprep.subr.mxu0 %v540_v40 }
 0x109   : > { %804 = vmatpush2.msra.mxu1 %v537_v41  ;;  %875 = vmatpush2.msra.mxu0 %v539_v42 }
 0x10a   : > { %805 = vmatprep.subr.mxu1 %v530_v43  ;;  %876 = vmatprep.subr.mxu0 %v532_v44 }
 0x10b   : > { %806 = vmatpush2.msra.mxu1 %v529_v45  ;;  %877 = vmatpush2.msra.mxu0 %v531_v46 }
 0x10c   : > { %807 = vmatprep.subr.mxu1 %v522_v47  ;;  %878 = vmatprep.subr.mxu0 %v524_v48 }
 0x10d   : > { %808 = vmatpush2.msra.mxu1 %v521_v49  ;;  %879 = vmatpush2.msra.mxu0 %v523_v50 }
 0x10e   : > { %809 = vmatprep.subr.mxu1 %v514_v51  ;;  %880 = vmatprep.subr.mxu0 %v516_v52 }
 0x10f   : > { %810 = vmatpush2.msra.mxu1 %v513_v53  ;;  %881 = vmatpush2.msra.mxu0 %v515_v54 }
 0x110   : > { %811 = vmatprep.subr.mxu1 %v506_v55  ;;  %882 = vmatprep.subr.mxu0 %v508_v56 }
 0x111   : > { %812 = vmatpush2.msra.mxu1 %v505_v57  ;;  %883 = vmatpush2.msra.mxu0 %v507_v58 }
 0x112   : > { %813 = vmatprep.subr.mxu1 %v498_v59  ;;  %884 = vmatprep.subr.mxu0 %v500_v60 }
 0x113   : > { %814 = vmatpush2.msra.mxu1 %v497_v61  ;;  %885 = vmatpush2.msra.mxu0 %v499_v62 }
 0x114   : > { %815 = vmatprep.subr.mxu1 %v490_v63  ;;  %886 = vmatprep.subr.mxu0 %v492_v0 }
 0x115   : > { %816 = vmatpush2.msra.mxu1 %v489_v1  ;;  %887 = vmatpush2.msra.mxu0 %v491_v2 }
 0x116   : > { %817 = vmatprep.subr.mxu1 %v482_v3  ;;  %888 = vmatprep.subr.mxu0 %v484_v4 }
 0x117   : > { %818 = vmatpush2.msra.mxu1 %v481_v5  ;;  %889 = vmatpush2.msra.mxu0 %v483_v7 }
 0x118   : > { %820 = vmatmul.mubr.f32.vlgmr.msra.gmra.mxu1 %v1535_v6  ;;  %891 = vmatmul.mubr.f32.vlgmr.msra.gmra.mxu0 %v1535_v6 }
 0x197   : > { %v679_v10 = vpop.f32.mrf.mxu1  ;;  %v750_v11 = vpop.f32.mrf.mxu0 }
 0x198   : > { %v680_v14 = vadd.f32 %v679_v10, %v605_v8  ;;  %v751_v15 = vadd.f32 %v750_v11, %v607_v9 }
 0x199   : > { %v681_v16 = vpop.f32.mrf.mxu1  ;;  %v752_v17 = vpop.f32.mrf.mxu0 }
 0x19a   : > { %897 = vst [vmem:[%s270_s11] sm:$0xff] %v680_v14  ;;  %899 = vst [vmem:[%s270_s11 + $0x10] sm:$0xff] %v751_v15  ;;  %v682_v6 = vadd.f32 %v681_v16, %v606_v12  ;;  %v753_v18 = vadd.f32 %v752_v17, %v608_v13 }
 0x19c   : > { %898 = vst [vmem:[%s270_s11 + $0x8] sm:$0xff] %v682_v6  ;;  %900 = vst [vmem:[%s270_s11 + $0x18] sm:$0xff] %v753_v18 }
 0x1d8   : > { %v821_v21 = vpop.f32.mrf.mxu1  ;;  %v892_v22 = vpop.f32.mrf.mxu0 }
 0x1d9   : > { %v822_v25 = vadd.f32 %v821_v21, %v609_v19  ;;  %v893_v26 = vadd.f32 %v892_v22, %v611_v20 }
 0x1da   : > { %v823_v27 = vpop.f32.mrf.mxu1  ;;  %v894_v28 = vpop.f32.mrf.mxu0 }
 0x1db   : > { %901 = vst [vmem:[%s270_s11 + $0x20] sm:$0xff] %v822_v25  ;;  %903 = vst [vmem:[%s270_s11 + $0x30] sm:$0xff] %v893_v26  ;;  %v824_v29 = vadd.f32 %v823_v27, %v610_v23  ;;  %v895_v30 = vadd.f32 %v894_v28, %v612_v24 }
 0x1dd   : > { %902 = vst [vmem:[%s270_s11 + $0x28] sm:$0xff] %v824_v29  ;;  %904 = vst [vmem:[%s270_s11 + $0x38] sm:$0xff] %v895_v30 }
 0x1de PF: > { %s14_s17 = sadd.s32 1, %s1090_s17   ;;  %s1940_s15 = smov %s1086_s16 }
 0x1df   : > { %p11_p5 = scmp.ge.s32.totalorder %s14_s17, 4   ;;  %s1941_s16 = smov %s1943_s18 }
 0x1e1   :  { %13 = sbr.rel (!%p11_p5) target bundleno = 2 (0x2), region = 72 }

</bundles_post_ra>
